<compile_context>
chip_gen: v6e
topology: v6e:2x2x1
jax: 0.10.0
libtpu: 0.0.40
codegen_flags: <defaults>
</compile_context>

<pallas_src>
import math

import jax
import jax.numpy as jnp
from jax.experimental import pallas as pl
from jax.experimental.pallas import tpu as pltpu

_LANES = 128
_TARGET_TILE_ROWS = 2048      # ~1 MiB per f32 input block -> near HBM roofline
_NUM_SPLITS = 2               # parallel axis: both TCs on v7x, harmless on v5e/v6e


def _round_up(a, b):
    return ((a + b - 1) // b) * b


def _isw_mse_kernel(x_ref, y_ref, w_ref, o_ref, acc_ref):
    """Accumulate sum(w*(x-y)^2) for one split over the inner (arbitrary) axis."""
    @pl.when(pl.program_id(1) == 0)
    def _():
        acc_ref[...] = jnp.zeros_like(acc_ref)

    d = x_ref[...].astype(jnp.float32) - y_ref[...].astype(jnp.float32)
    prod = w_ref[...].astype(jnp.float32) * d * d           # (tile_rows, 128)
    # (tile_rows, 128) -> (tile_rows//8, 8, 128) is a free re-view of the
    # (8,128) tiles; the axis-0 sum is plain VPU adds (no cross-lane reduce).
    tile_rows = prod.shape[0]
    acc_ref[...] += jnp.sum(prod.reshape(tile_rows // 8, 8, _LANES), axis=0)

    @pl.when(pl.program_id(1) == pl.num_programs(1) - 1)
    def _():
        o_ref[0] = acc_ref[...]


def is_weight_mse_loss(x, y, w):
    """mean(w * (x - y)^2) -- same semantics as the PyTorch ISWeightMSELoss."""
    shape = jnp.broadcast_shapes(x.shape, y.shape, w.shape)
    n = int(math.prod(shape)) if len(shape) else 1
    # TODO(synk): per-sample (rows, 1) IS weights are materialized to the full
    # shape here; streaming them un-broadcast would cut HBM traffic further.
    xf = jnp.broadcast_to(x, shape).reshape(-1)
    yf = jnp.broadcast_to(y, shape).reshape(-1)
    wf = jnp.broadcast_to(w, shape).reshape(-1)

    # ---- tile sizing from the VMEM budget, minimal padding ----
    rows = -(-n // _LANES)
    rows_per_split = -(-rows // _NUM_SPLITS)
    steps = max(1, -(-rows_per_split // _TARGET_TILE_ROWS))
    tile_rows = _round_up(max(1, -(-rows_per_split // steps)), 8)
    padded_rows = _NUM_SPLITS * steps * tile_rows

    pad = padded_rows * _LANES - n
    if pad:
        # zero padding: w == 0 on the tail, so it adds nothing to the sum.
        xf = jnp.pad(xf, (0, pad))
        yf = jnp.pad(yf, (0, pad))
        wf = jnp.pad(wf, (0, pad))

    x2 = xf.reshape(padded_rows, _LANES)
    y2 = yf.reshape(padded_rows, _LANES)
    w2 = wf.reshape(padded_rows, _LANES)

    in_map = lambda s, i: (s * steps + i, 0)
    in_spec = pl.BlockSpec((tile_rows, _LANES), in_map)

    partials = pl.pallas_call(
        _isw_mse_kernel,
        out_shape=jax.ShapeDtypeStruct((_NUM_SPLITS, 8, _LANES), jnp.float32),
        grid_spec=pltpu.PrefetchScalarGridSpec(
            num_scalar_prefetch=0,
            grid=(_NUM_SPLITS, steps),
            in_specs=[in_spec, in_spec, in_spec],
            out_specs=pl.BlockSpec((1, 8, _LANES), lambda s, i: (s, 0, 0)),
            scratch_shapes=[pltpu.VMEM((8, _LANES), jnp.float32)],
        ),
        compiler_params=pltpu.CompilerParams(
            dimension_semantics=("parallel", "arbitrary"),
            # 3 inputs x 2 pipeline buffers x ~1 MiB fits comfortably; stays
            # well under the v7x 64 MiB physical VMEM with headroom.
            vmem_limit_bytes=32 * 1024 * 1024,
        ),
    )(x2, y2, w2)

    return jnp.sum(partials) / jnp.float32(n)


if __name__ == "__main__":
    key = jax.random.PRNGKey(0)
    kx, ky, kw = jax.random.split(key, 3)

    # Case 1: aligned small shape (batch of 16 samples x 128 Q-value targets).
    shape = (16, 128)
    x = jax.random.normal(kx, shape, dtype=jnp.float32)
    y = jax.random.normal(ky, shape, dtype=jnp.float32)
    w = jax.random.uniform(kw, shape, dtype=jnp.float32)   # IS weights >= 0

    loss = jax.block_until_ready(is_weight_mse_loss(x, y, w))
    ref = jnp.mean(w * (x - y) ** 2)
    assert jnp.allclose(loss, ref, rtol=1e-6, atol=1e-6), (loss, ref)

    # Case 2: non-aligned shape + per-sample IS weights (broadcast), exercises
    # the padding / masking path.
    shape2 = (50, 37)
    x2 = jax.random.normal(kx, shape2, dtype=jnp.float32)
    y2 = jax.random.normal(ky, shape2, dtype=jnp.float32)
    w2 = jax.random.uniform(kw, (50, 1), dtype=jnp.float32)
    loss2 = jax.block_until_ready(is_weight_mse_loss(x2, y2, w2))
    ref2 = jnp.mean(w2 * (x2 - y2) ** 2)
    assert jnp.allclose(loss2, ref2, rtol=1e-6, atol=1e-6), (loss2, ref2)

    print("KERNEL_OK")
</pallas_src>

<mosaic_0001>
module attributes {stable_mosaic.version = 11 : i64} {
  func.func @_isw_mse_kernel(%arg0: i32, %arg1: i32, %arg2: memref<8x128xf32, #tpu.memory_space<vmem>>, %arg3: memref<8x128xf32, #tpu.memory_space<vmem>>, %arg4: memref<8x128xf32, #tpu.memory_space<vmem>>, %arg5: memref<1x8x128xf32, #tpu.memory_space<vmem>>, %arg6: memref<8x128xf32, #tpu.memory_space<vmem>>) attributes {dimension_semantics = [#tpu.dimension_semantics<parallel>, #tpu.dimension_semantics<arbitrary>], iteration_bounds = array<i64: 2, 1>, scalar_prefetch = 0 : i64, scratch_operands = 1 : i64, tpu.core_type = #tpu.core_type<tc>, window_params = [{transform_indices = @transform_0, window_bounds = array<i64: 8, 128>}, {transform_indices = @transform_1, window_bounds = array<i64: 8, 128>}, {transform_indices = @transform_2, window_bounds = array<i64: 8, 128>}, {transform_indices = @transform_3, window_bounds = array<i64: 1, 8, 128>}]} {
    %c0_i32 = arith.constant 0 : i32
    %0 = arith.cmpi eq, %arg1, %c0_i32 : i32
    %1 = arith.extui %0 : i1 to i32
    %c0_i32_0 = arith.constant 0 : i32
    %2 = arith.cmpi ne, %1, %c0_i32_0 : i32
    scf.if %2 {
      %cst_12 = arith.constant 0.000000e+00 : f32
      %17 = vector.broadcast %cst_12 : f32 to vector<8x128xf32>
      %c0_13 = arith.constant 0 : index
      %c0_14 = arith.constant 0 : index
      %18 = vector.load %arg6[%c0_13, %c0_14] : memref<8x128xf32, #tpu.memory_space<vmem>>, vector<8x128xf32>
      tpu.vector_store %arg6[%c0_13, %c0_14], %17 {strides = array<i32>} : memref<8x128xf32, #tpu.memory_space<vmem>>, vector<8x128xf32>,
    } else {
    }
    %c0 = arith.constant 0 : index
    %c0_1 = arith.constant 0 : index
    %3 = vector.load %arg2[%c0, %c0_1] : memref<8x128xf32, #tpu.memory_space<vmem>>, vector<8x128xf32>
    %c0_2 = arith.constant 0 : index
    %c0_3 = arith.constant 0 : index
    %4 = vector.load %arg3[%c0_2, %c0_3] : memref<8x128xf32, #tpu.memory_space<vmem>>, vector<8x128xf32>
    %5 = arith.subf %3, %4 : vector<8x128xf32>
    %c0_4 = arith.constant 0 : index
    %c0_5 = arith.constant 0 : index
    %6 = vector.load %arg4[%c0_4, %c0_5] : memref<8x128xf32, #tpu.memory_space<vmem>>, vector<8x128xf32>
    %7 = arith.mulf %6, %5 : vector<8x128xf32>
    %8 = arith.mulf %7, %5 : vector<8x128xf32>
    %c0_6 = arith.constant 0 : index
    %c0_7 = arith.constant 0 : index
    %9 = vector.load %arg6[%c0_6, %c0_7] : memref<8x128xf32, #tpu.memory_space<vmem>>, vector<8x128xf32>
    %10 = vector.shape_cast %8 : vector<8x128xf32> to vector<1x8x128xf32>
    %cst = arith.constant dense<0.000000e+00> : vector<8x128xf32>
    %11 = vector.multi_reduction <add>, %10, %cst [0] : vector<1x8x128xf32> to vector<8x128xf32>
    %12 = arith.addf %9, %11 : vector<8x128xf32>
    %c0_8 = arith.constant 0 : index
    %c0_9 = arith.constant 0 : index
    %13 = vector.load %arg6[%c0_8, %c0_9] : memref<8x128xf32, #tpu.memory_space<vmem>>, vector<8x128xf32>
    tpu.vector_store %arg6[%c0_8, %c0_9], %12 {strides = array<i32>} : memref<8x128xf32, #tpu.memory_space<vmem>>, vector<8x128xf32>,
    %c0_i32_10 = arith.constant 0 : i32
    %14 = arith.cmpi eq, %arg1, %c0_i32_10 : i32
    %15 = arith.extui %14 : i1 to i32
    %c0_i32_11 = arith.constant 0 : i32
    %16 = arith.cmpi ne, %15, %c0_i32_11 : i32
    scf.if %16 {
      %c0_12 = arith.constant 0 : index
      %c0_13 = arith.constant 0 : index
      %17 = vector.load %arg6[%c0_12, %c0_13] : memref<8x128xf32, #tpu.memory_space<vmem>>, vector<8x128xf32>
      %c0_14 = arith.constant 0 : index
      %c0_15 = arith.constant 0 : index
      %c0_16 = arith.constant 0 : index
      %18 = vector.load %arg5[%c0_14, %c0_15, %c0_16] : memref<1x8x128xf32, #tpu.memory_space<vmem>>, vector<1x8x128xf32>
      %19 = vector.shape_cast %18 : vector<1x8x128xf32> to vector<8x128xf32>
      %20 = vector.shape_cast %17 : vector<8x128xf32> to vector<1x8x128xf32>
      tpu.vector_store %arg5[%c0_14, %c0_15, %c0_16], %20 {strides = array<i32>} : memref<1x8x128xf32, #tpu.memory_space<vmem>>, vector<1x8x128xf32>,
    } else {
    }
    return
  }
  func.func @transform_0(%arg0: i32, %arg1: i32) -> (i32, i32) {
    %c1_i32 = arith.constant 1 : i32
    %0 = arith.muli %arg0, %c1_i32 : i32
    %1 = arith.addi %0, %arg1 : i32
    %c0_i32 = arith.constant 0 : i32
    %c0_i32_0 = arith.constant 0 : i32
    return %1, %c0_i32 : i32, i32
  }
  func.func @transform_1(%arg0: i32, %arg1: i32) -> (i32, i32) {
    %c1_i32 = arith.constant 1 : i32
    %0 = arith.muli %arg0, %c1_i32 : i32
    %1 = arith.addi %0, %arg1 : i32
    %c0_i32 = arith.constant 0 : i32
    %c0_i32_0 = arith.constant 0 : i32
    return %1, %c0_i32 : i32, i32
  }
  func.func @transform_2(%arg0: i32, %arg1: i32) -> (i32, i32) {
    %c1_i32 = arith.constant 1 : i32
    %0 = arith.muli %arg0, %c1_i32 : i32
    %1 = arith.addi %0, %arg1 : i32
    %c0_i32 = arith.constant 0 : i32
    %c0_i32_0 = arith.constant 0 : i32
    return %1, %c0_i32 : i32, i32
  }
  func.func @transform_3(%arg0: i32, %arg1: i32) -> (i32, i32, i32) {
    %c0_i32 = arith.constant 0 : i32
    %c0_i32_0 = arith.constant 0 : i32
    %c0_i32_1 = arith.constant 0 : i32
    return %arg0, %c0_i32, %c0_i32_0 : i32, i32, i32
  }
}

</mosaic_0001>

<bundles_post_ra>
// kernel: tpu_custom_call.1
= control target key start
LH: loop header
LB: loop body
LE: loop exit
PB: predicated region body
PF: predicated region fallthrough
CT: control target
= control target key end

     0   :  { %s916_s0 = inlined_call_operand.hbm [shape: f32[16,128], index: 0, kind: input, shape index: {}]   ;;  %s917_s1 = inlined_call_operand.hbm [shape: f32[16,128], index: 1, kind: input, shape index: {}]   ;;  %s918_s2 = inlined_call_operand.hbm [shape: f32[16,128], index: 2, kind: input, shape index: {}]   ;;  %s919_s3 = inlined_call_operand.hbm [shape: f32[2,8,128], index: 3, kind: output, shape index: {}]  }
   0x1   :  { %923 = sst [smem:[#allocation15_spill]] %s917_s1 }
   0x2   :  { %8 = vsyncpa [#allocation4], 0 }
   0x3   :  { %10 = vsyncpa [#allocation4 + $0x1], 0 }
   0x4   :  { %11 = vsyncpa [#allocation7], 0 }
   0x5   :  { %13 = vsyncpa [#allocation7 + $0x1], 0 }
   0x6   :  { %14 = vsyncpa [#allocation5], 0 }
   0x7   :  { %16 = vsyncpa [#allocation5 + $0x1], 0  ;;  %s724_s12 = smov 0   ;;  %s726_s13 = smov 0  }
   0x8   :  { %s728_s14 = smov 0   ;;  %s730_s15 = smov 0  }
   0x9   :  { %s732_s16 = smov 0   ;;  %s734_s17 = smov 0  }
   0xa LB: > { %924 = sst [smem:[#allocation13_spill]] %s694_s16  ;;  %s755_s18 = sadd.s32 4294967295, %s698_s17   ;;  %s698_s17 = sphi %s734_s17, %s22_s17   ;;  %s694_s16 = sphi %s732_s16, %s936_s16   ;;  %s690_s15 = sphi %s730_s15, %s935_s15   ;;  %s686_s14 = sphi %s728_s14, %s939_s14   ;;  %s682_s13 = sphi %s726_s13, %s938_s13   ;;  %s678_s12 = sphi %s724_s12, %s937_s12  }
   0xb   : > { %s440_s19 = sadd.s32 4294967294, %s698_s17   ;;  %s34_s20 = sadd.s32 1, %s694_s16 }
   0xc   : > { %s43_s21 = sadd.s32 1, %s686_s14  ;;  %p36_p0 = scmp.ge.s32.totalorder %s34_s20, 2 }
   0xd   : > { %p50_p1 = scmp.ne.s32.totalorder %s686_s14, %s682_s13  ;;  %p51_p2 = scmp.eq.s32.totalorder %s698_s17, 0 }
   0xe   : > { %p56_p3 = scmp.ne.s32.totalorder %s682_s13, %s678_s12  ;;  %s941_s20 = smov (%p36_p0, %s34_s20), 0 }
   0xf   : > { %925 = sst [smem:[#allocation14_spill]] %s941_s20  ;;  %p767_p4 = por %p51_p2, %p50_p1 }
  0x10   : > { %p57_p5 = scmp.eq.s32.totalorder %s755_s18, 0  ;;  %s40_s23 = ssub.s32 %s694_s16, %s941_s20 }
  0x11   : > { %p136_p6 = scmp.eq.s32.totalorder %s755_s18, 1  ;;  %p41_p7 = scmp.eq.s32.totalorder %s40_s23, 0 }
  0x12   : > { %p775_p8 = por %p57_p5, %p56_p3  ;;  %p142_p10 = scmp.eq.s32.totalorder %s440_s19, 1 }
  0x13   : > { %p779_p9 = por %p136_p6, %p50_p1  ;;  %p480_p13 = scmp.lt.s32.totalorder %s698_s17, 2 }
  0x14   : > { %s784_s26 = scalar_select %p41_p7, %s686_s14, %s43_s21  }
  0x15   : > { %p786_p11 = por %p142_p10, %p56_p3  ;;  %s920_s28 = sand.u32 1, %s686_s14  }
  0x16   : > { %s795_s29 = sshll.u32 %s920_s28, 3  ;;  %s798_s30 = sshll.u32 %s694_s16, 7 }
  0x17   : > { %p802_p0 = pnand %p480_p13, %p767_p4  ;;  %s181_s5 = sand.u32 1, %s698_s17  }
  0x18   : > { %s931_s1 = sld [smem:[#allocation15_spill]]  ;;  %s185_s9 = scalar_lea.vmem [#allocation6], %s795_s29 }
  0x19   : > { %s193_s10 = sshll.u32 %s185_s9, 4  ;;  %p449_p1 = scmp.ge.s32.totalorder %s698_s17, 1  ;;  %s194_s10 = int_to_ptr.vmem [resolvable:$true] %s193_s10 }
  0x1a   : > { %p217_p2 = scmp.lt.s32.totalorder %s698_s17, 3  ;;  %s814_s11 = scalar_lea.sflag [#allocation7], %s181_s5 }
  0x1b   : > { %p532_p3 = pneg %p802_p0  ;;  %s543_s19 = scalar_lea.vmem %s194_s10, 128 }
  0x1c   : > { %p544_p4 = scmp.ne.s32.totalorder %s194_s10, %s543_s19  ;;  %s700_s21 = smov [#allocation6]  }
  0x1d   : > { %s548_s22 = sshll.u32 %s700_s21, 4  ;;  %s549_s22 = int_to_ptr.vmem [resolvable:$false] %s548_s22 }
  0x1e   : > { %s191_s8 = scalar_lea.hbm %s931_s1, %s798_s30  ;;  %p546_p5 = pnand %p544_p4, %p532_p3 }
  0x1f   : > { %s550_s23 = scalar_lea.vmem %s549_s22, 256  ;;  %p551_p7 = scmp.lt.s32.totalorder %s194_s10, %s549_s22 }
  0x20   : > { %p547_p6 = pneg %p546_p5  ;;  %p552_p10 = scmp.lt.s32.totalorder %s550_s23, %s543_s19 }
  0x22   : > { %p553_p13 = por %p552_p10, %p551_p7 }
  0x24   : > { %p554_p12 = pnand %p553_p13, %p547_p6 }
  0x26   : > { %557 = shalt.err (!%p554_p12)
}
  0x27   : > { %472 = dma.hbm_to_vmem [thread:$0]  (!%p802_p0), %s191_s8, 128, %s194_s10, %s814_s11  }
  0x28   : > { %p828_p4 = pnand %p449_p1, %p217_p2  ;;  %s172_s9 = scalar_lea.hbm %s916_s0, %s798_s30 }
  0x29   : > { %s166_s19 = scalar_lea.vmem [#allocation3], %s795_s29  ;;  %s210_s28 = scalar_lea.hbm %s918_s2, %s798_s30 }
  0x2a   : > { %s174_s21 = sshll.u32 %s166_s19, 4  ;;  %s933_s1 = sand.u32 1, %s686_s14   ;;  %s175_s21 = int_to_ptr.vmem [resolvable:$true] %s174_s21 }
  0x2b   : > { %s163_s20 = scalar_lea.sflag [#allocation4], %s933_s1  ;;  %s571_s8 = scalar_lea.vmem %s175_s21, 128 }
  0x2c   : > { %p572_p12 = scmp.ne.s32.totalorder %s175_s21, %s571_s8  ;;  %s701_s10 = smov [#allocation3]  }
  0x2d   : > { %s576_s16 = sshll.u32 %s701_s10, 4  ;;  %s577_s16 = int_to_ptr.vmem [resolvable:$false] %s576_s16 }
  0x2e   : > { %p574_p1 = pnand %p572_p12, %p532_p3  ;;  %s578_s6 = scalar_lea.vmem %s577_s16, 256 }
  0x2f   : > { %p579_p5 = scmp.lt.s32.totalorder %s175_s21, %s577_s16  ;;  %p580_p6 = scmp.lt.s32.totalorder %s578_s6, %s571_s8 }
  0x30   : > { %p575_p2 = pneg %p574_p1 }
  0x31   : > { %p581_p7 = por %p580_p6, %p579_p5 }
  0x33   : > { %p582_p10 = pnand %p581_p7, %p575_p2 }
  0x35   : > { %585 = shalt.err (!%p582_p10)
}
  0x36   : > { %469 = dma.hbm_to_vmem [thread:$0]  (!%p802_p0), %s172_s9, 128, %s175_s21, %s163_s20  }
  0x37   : > { %s204_s1 = scalar_lea.vmem [#allocation8], %s795_s29  ;;  %s702_s22 = smov [#allocation8]  }
  0x38   : > { %s212_s7 = sshll.u32 %s204_s1, 4  ;;  %s604_s16 = sshll.u32 %s702_s22, 4  ;;  %s213_s7 = int_to_ptr.vmem [resolvable:$true] %s212_s7  ;;  %s605_s16 = int_to_ptr.vmem [resolvable:$false] %s604_s16 }
  0x39   : > { %s599_s19 = scalar_lea.vmem %s213_s7, 128  ;;  %s606_s23 = scalar_lea.vmem %s605_s16, 256 }
  0x3a   : > { %p600_p13 = scmp.ne.s32.totalorder %s213_s7, %s599_s19  ;;  %p607_p2 = scmp.lt.s32.totalorder %s213_s7, %s605_s16 }
  0x3b   : > { %p608_p5 = scmp.lt.s32.totalorder %s606_s23, %s599_s19 }
  0x3c   : > { %p602_p12 = pnand %p600_p13, %p532_p3 }
  0x3d   : > { %p609_p6 = por %p608_p5, %p607_p2 }
  0x3e   : > { %p603_p1 = pneg %p602_p12 }
  0x40   : > { %p610_p7 = pnand %p609_p6, %p603_p1 }
  0x42   : > { %613 = shalt.err (!%p610_p7)
}
  0x43   : > { %475 = dma.hbm_to_vmem [thread:$0]  (!%p802_p0), %s210_s28, 128, %s213_s7, %s814_s11  }
  0x44   : > { %221 = sbr.rel (%p828_p4) target bundleno = 101 (0x65), region = 32  ;;  %s863_s9 = sand.u32 (!%p828_p4), 1, %s682_s13  }
  0x45   : > { %s450_s21 = sshll.u32 (!%p828_p4), %s863_s9, 3  ;;  %s224_s8 = scalar_lea.sflag (!%p828_p4), [#allocation4], %s863_s9 }
  0x46   : > { %s227_s10 = scalar_lea.vmem (!%p828_p4), [#allocation3], %s450_s21 }
  0x49   : > { %665 = dma.done.wait (%p775_p8), %s224_s8, 128  }
  0x4a   : > { %667 = vsyncadd (%p775_p8), %s224_s8, 4294967168  ;;  %s232_s28 = sand.u32 1, %s755_s18   ;;  %s236_s4 = scalar_lea.vmem [#allocation6], %s450_s21 }
  0x4b   : > { %s233_s30 = scalar_lea.sflag [#allocation7], %s232_s28 }
  0x4c   : > { %669 = dma.done.wait (%p775_p8), %s233_s30, 256  }
  0x4d   : > { %671 = vsyncadd (%p775_p8), %s233_s30, 4294967040  ;;  %v286_v0 = vld [vmem:[%s227_s10] sm:$0xff]  ;;  %v287_v1 = vld [vmem:[%s236_s4] sm:$0xff]  ;;  %s245_s11 = scalar_lea.vmem [#allocation8], %s450_s21  ;;  %s277_s5 = scalar_lea.vmem [#allocation9], %s450_s21 }
  0x4e   : > { %v289_v2 = vld [vmem:[%s245_s11] sm:$0xff]  ;;  %v288_v3 = vsub.f32 %v286_v0, %v287_v1  ;;  %s315_s6 = sshll.u32 %s277_s5, 4  ;;  %s455_s1 = sshll.u32 %s690_s15, 7  ;;  %s316_s6 = int_to_ptr.vmem [resolvable:$true] %s315_s6 }
  0x4f   : > { %s313_s19 = scalar_lea.hbm %s919_s3, %s455_s1  ;;  %s302_s24 = scalar_lea.sflag [#allocation5], %s863_s9 }
  0x50   : > { %v290_v4 = vmul.f32 %v289_v2, %v288_v3  ;;  %s614_s22 = scalar_lea.vmem %s316_s6, 128  ;;  %s703_s16 = smov [#allocation9]  }
  0x51   : > { %p615_p8 = scmp.ne.s32.totalorder %s316_s6, %s614_s22  ;;  %s618_s23 = sshll.u32 %s703_s16, 4  ;;  %s619_s23 = int_to_ptr.vmem [resolvable:$false] %s618_s23 }
  0x52   : > { %v291_v5 = vmul.f32 %v290_v4, %v288_v3  ;;  %s620_s20 = scalar_lea.vmem %s619_s23, 256  ;;  %p621_p4 = scmp.lt.s32.totalorder %s316_s6, %s619_s23 }
  0x53   : > { %p616_p0 = pnand %p615_p8, %p779_p9  ;;  %p622_p10 = scmp.lt.s32.totalorder %s620_s20, %s614_s22 }
  0x54   : > { %300 = vst [vmem:[%s277_s5] sm:$0xff] %v291_v5 }
  0x55   : > { %p617_p3 = pneg %p616_p0  ;;  %p623_p13 = por %p622_p10, %p621_p4 }
  0x57   : > { %p624_p12 = pnand %p623_p13, %p617_p3 }
  0x59   : > { %627 = shalt.err (!%p624_p12)
}
  0x5a   : > { %s628_s15 = scalar_lea.hbm %s313_s19, 128  ;;  %s632_s21 = scalar_lea.hbm %s919_s3, 256 }
  0x5b   : > { %p629_p1 = scmp.ne.s32.totalorder %s313_s19, %s628_s15  ;;  %p633_p6 = scmp.lt.s32.totalorder %s313_s19, %s919_s3 }
  0x5c   : > { %p634_p7 = scmp.lt.s32.totalorder %s632_s21, %s628_s15 }
  0x5d   : > { %p630_p2 = pnand %p629_p1, %p779_p9 }
  0x5e   : > { %p635_p8 = por %p634_p7, %p633_p6 }
  0x5f   : > { %p631_p5 = pneg %p630_p2 }
  0x61   : > { %p636_p0 = pnand %p635_p8, %p631_p5 }
  0x63   : > { %639 = shalt.err (!%p636_p0)
}
  0x64   : > { %464 = dma.vmem_to_hbm [thread:$0]  (%p779_p9), %s316_s6, 128, %s313_s19, %s302_s24  }
  0x65 PF: > { %s327_s28 = sand.u32 1, %s678_s12   ;;  %p934_p3 = scmp.ge.s32.totalorder %s698_s17, 2 }
  0x66   : > { %s328_s30 = scalar_lea.sflag [#allocation5], %s327_s28 }
  0x67   : > { %p477_p4 = pnand %p934_p3, %p786_p11 }
  0x69   : > { %p478_p10 = pneg %p477_p4 }
  0x6b   : > { %673 = dma.done.wait (%p478_p10), %s328_s30, 128  }
  0x6c   : > { %675 = vsyncadd (%p478_p10), %s328_s30, 4294967168  ;;  %s22_s17 = sadd.s32 1, %s698_s17   ;;  %s935_s15 = sld [smem:[#allocation13_spill]] }
  0x6d   : > { %p19_p13 = scmp.ge.s32.totalorder %s22_s17, 4   ;;  %s936_s16 = sld [smem:[#allocation14_spill]] }
  0x6e   : > { %s937_s12 = smov %s682_s13  ;;  %s938_s13 = smov %s686_s14 }
  0x6f   : > { %s939_s14 = smov %s784_s26  ;;  %21 = sbr.rel (!%p19_p13) target bundleno = 10 (0xa), region = 109 }
  0x74   :  { %333 = vsyncpa [#allocation4], 1 }
  0x75   :  { %335 = vsyncpa [#allocation4 + $0x1], 1 }
  0x76   :  { %336 = vsyncpa [#allocation7], 1 }
  0x77   :  { %338 = vsyncpa [#allocation7 + $0x1], 1 }
  0x78   :  { %339 = vsyncpa [#allocation5], 1 }
  0x79   :  { %341 = vsyncpa [#allocation5 + $0x1], 1 }

</bundles_post_ra>
